<compile_context>
chip_gen: v5e
topology: v5e:2x2
jax: 0.10.0
libtpu: 0.0.40
codegen_flags: <defaults>
</compile_context>

<pallas_src>
import functools

import jax
import jax.numpy as jnp
from jax.experimental import pallas as pl
from jax.experimental.pallas import tpu as pltpu


def _round_up(x, m):
    return (x + m - 1) // m * m


def _sublane_multiple(*arrays):
    """Sublane alignment: 8 for 32-bit, 16 for 16-bit, 32 for 8-bit dtypes."""
    m = 8
    for a in arrays:
        bits = jnp.dtype(a.dtype).itemsize * 8
        m = max(m, 8 * max(1, 32 // bits))
    return m


def _sigmoid_bce_kernel(x_ref, t_ref, m_ref, o_ref, acc_ref, *, inv_len):
    """One (TM, TL) tile: mask-weighted stable BCE-with-logits, row-sum accumulate."""
    k = pl.program_id(1)

    @pl.when(k == 0)
    def _():
        acc_ref[...] = jnp.zeros_like(acc_ref)

    # Cast to float32 in-kernel (matches the torch module's .float()); lets the
    # caller ship bf16 inputs/targets and int8 mask to cut HBM bytes.
    x = x_ref[...].astype(jnp.float32)
    t = t_ref[...].astype(jnp.float32)
    w = m_ref[...].astype(jnp.float32)

    # Numerically stable binary_cross_entropy_with_logits (reduction='none'),
    # elementwise weighted by `mask`:
    #   loss = w * ( max(x, 0) - x * t + log1p(exp(-|x|)) )
    # exp/log1p run on the EUP slot; they are free filler under the DMA.
    loss = w * (jnp.maximum(x, 0.0) - x * t + jnp.log1p(jnp.exp(-jnp.abs(x))))

    # Cross-lane row reduction -> XLU slot (idle here); accumulate over len tiles.
    acc_ref[...] += jnp.sum(loss, axis=1, keepdims=True)

    @pl.when(k == pl.num_programs(1) - 1)
    def _():
        # res.mean(dim=1): divide by the ORIGINAL row length L. Padded columns
        # carry mask == 0, so they never contribute to the accumulated sum.
        o_ref[...] = acc_ref[...] * inv_len


def sigmoid_bce_loss(inputs, targets, mask, *, block_rows=256, block_cols=2048):
    """Pallas TPU implementation of SigmoidBinaryCrossEntropyLoss.forward."""
    assert inputs.shape == targets.shape == mask.shape
    assert inputs.ndim == 2
    B, L = inputs.shape

    # Tile sizes: sublane axis aligned for the narrowest input dtype (8/16/32),
    # lane axis a multiple of 128; prefer a long lane extent (lane-dense loads).
    sub = _sublane_multiple(inputs, targets, mask)
    TM = _round_up(min(block_rows, B), sub)
    TL = _round_up(min(block_cols, L), 128)
    Bp = _round_up(B, TM)
    Lp = _round_up(L, TL)

    if (Bp, Lp) != (B, L):
        # Zero-pad so every grid block is fully in bounds. Padded mask == 0
        # guarantees zero loss contribution; padded rows are sliced off below.
        pad = ((0, Bp - B), (0, Lp - L))
        inputs = jnp.pad(inputs, pad)
        targets = jnp.pad(targets, pad)
        mask = jnp.pad(mask, pad)

    grid = (Bp // TM, Lp // TL)
    kernel = functools.partial(_sigmoid_bce_kernel, inv_len=float(1.0 / L))

    out = pl.pallas_call(
        kernel,
        out_shape=jax.ShapeDtypeStruct((Bp, 1), jnp.float32),
        grid_spec=pltpu.PrefetchScalarGridSpec(
            num_scalar_prefetch=0,
            grid=grid,
            in_specs=[
                pl.BlockSpec((TM, TL), lambda i, k: (i, k)),
                pl.BlockSpec((TM, TL), lambda i, k: (i, k)),
                pl.BlockSpec((TM, TL), lambda i, k: (i, k)),
            ],
            out_specs=pl.BlockSpec((TM, 1), lambda i, k: (i, 0)),
            scratch_shapes=[pltpu.VMEM((TM, 1), jnp.float32)],
        ),
        compiler_params=pltpu.CompilerParams(
            # Batch axis is embarrassingly parallel (v7x: shard across 2 TCs);
            # len axis carries the accumulator -> "arbitrary".
            dimension_semantics=("parallel", "arbitrary"),
            # Default f32 tiles: 3 inputs x 2 pipeline buffers x 256x2048x4B
            # = 12 MiB; 32 MiB budget leaves headroom on v5e/v6e/v7x.
            vmem_limit_bytes=32 * 1024 * 1024,
        ),
    )(inputs, targets, mask)

    return out[:B, 0]  # (B,)


def _reference(inputs, targets, mask):
    x = inputs.astype(jnp.float32)
    t = targets.astype(jnp.float32)
    w = mask.astype(jnp.float32)
    loss = w * (jnp.maximum(x, 0.0) - x * t + jnp.log1p(jnp.exp(-jnp.abs(x))))
    return loss.mean(axis=1)


if __name__ == "__main__":
    key = jax.random.PRNGKey(0)
    k1, k2, k3, k4, k5, k6 = jax.random.split(key, 6)

    # Case 1: module docstring shape (batch_size, len), f32 everywhere.
    B, L = 2, 8
    inputs = jax.random.normal(k1, (B, L), dtype=jnp.float32)
    targets = (jax.random.uniform(k2, (B, L)) > 0.5).astype(jnp.float32)
    mask = (jax.random.uniform(k3, (B, L)) > 0.25).astype(jnp.float32)

    out = sigmoid_bce_loss(inputs, targets, mask)
    jax.block_until_ready(out)
    ref = _reference(inputs, targets, mask)
    assert out.shape == (B,)
    assert jnp.allclose(out, ref, atol=2e-5, rtol=1e-5)

    # Case 2: non-aligned shape exercising the multi-tile grid, the len-axis
    # accumulator, wrapper zero-padding, and the narrow-dtype path
    # (bf16 inputs/targets, int8 mask) with small explicit tiles.
    B2, L2 = 72, 640
    inputs2 = jax.random.normal(k4, (B2, L2), dtype=jnp.float32).astype(jnp.bfloat16)
    targets2 = (jax.random.uniform(k5, (B2, L2)) > 0.5).astype(jnp.bfloat16)
    mask2 = (jax.random.uniform(k6, (B2, L2)) > 0.25).astype(jnp.int8)

    out2 = sigmoid_bce_loss(inputs2, targets2, mask2, block_rows=32, block_cols=256)
    jax.block_until_ready(out2)
    ref2 = _reference(inputs2, targets2, mask2)
    assert out2.shape == (B2,)
    assert jnp.allclose(out2, ref2, atol=2e-5, rtol=1e-5)

    print("KERNEL_OK")
</pallas_src>

<mosaic_0001>
module attributes {stable_mosaic.version = 11 : i64} {
  func.func @_sigmoid_bce_kernel(%arg0: i32, %arg1: i32, %arg2: memref<8x128xf32, #tpu.memory_space<vmem>>, %arg3: memref<8x128xf32, #tpu.memory_space<vmem>>, %arg4: memref<8x128xf32, #tpu.memory_space<vmem>>, %arg5: memref<8x1xf32, #tpu.memory_space<vmem>>, %arg6: memref<8x1xf32, #tpu.memory_space<vmem>>) attributes {dimension_semantics = [#tpu.dimension_semantics<parallel>, #tpu.dimension_semantics<arbitrary>], iteration_bounds = array<i64: 1, 1>, scalar_prefetch = 0 : i64, scratch_operands = 1 : i64, tpu.core_type = #tpu.core_type<tc>, window_params = [{transform_indices = @transform_0, window_bounds = array<i64: 8, 128>}, {transform_indices = @transform_1, window_bounds = array<i64: 8, 128>}, {transform_indices = @transform_2, window_bounds = array<i64: 8, 128>}, {transform_indices = @transform_3, window_bounds = array<i64: 8, 1>}]} {
    %c0_i32 = arith.constant 0 : i32
    %0 = arith.cmpi eq, %arg1, %c0_i32 : i32
    %1 = arith.extui %0 : i1 to i32
    %c0_i32_0 = arith.constant 0 : i32
    %2 = arith.cmpi ne, %1, %c0_i32_0 : i32
    scf.if %2 {
      %cst_14 = arith.constant 0.000000e+00 : f32
      %25 = vector.broadcast %cst_14 : f32 to vector<8x1xf32>
      %c0_15 = arith.constant 0 : index
      %c0_16 = arith.constant 0 : index
      %26 = vector.load %arg6[%c0_15, %c0_16] : memref<8x1xf32, #tpu.memory_space<vmem>>, vector<8x1xf32>
      tpu.vector_store %arg6[%c0_15, %c0_16], %25 {strides = array<i32>} : memref<8x1xf32, #tpu.memory_space<vmem>>, vector<8x1xf32>,
    } else {
    }
    %c0 = arith.constant 0 : index
    %c0_1 = arith.constant 0 : index
    %3 = vector.load %arg2[%c0, %c0_1] : memref<8x128xf32, #tpu.memory_space<vmem>>, vector<8x128xf32>
    %c0_2 = arith.constant 0 : index
    %c0_3 = arith.constant 0 : index
    %4 = vector.load %arg3[%c0_2, %c0_3] : memref<8x128xf32, #tpu.memory_space<vmem>>, vector<8x128xf32>
    %c0_4 = arith.constant 0 : index
    %c0_5 = arith.constant 0 : index
    %5 = vector.load %arg4[%c0_4, %c0_5] : memref<8x128xf32, #tpu.memory_space<vmem>>, vector<8x128xf32>
    %cst = arith.constant 0.000000e+00 : f32
    %6 = vector.broadcast %cst : f32 to vector<8x128xf32>
    %7 = arith.maximumf %3, %6 : vector<8x128xf32>
    %8 = arith.mulf %3, %4 : vector<8x128xf32>
    %9 = arith.subf %7, %8 : vector<8x128xf32>
    %10 = math.absf %3 : vector<8x128xf32>
    %cst_6 = arith.constant 0.000000e+00 : f32
    %11 = vector.broadcast %cst_6 : f32 to vector<8x128xf32>
    %12 = arith.subf %11, %10 : vector<8x128xf32>
    %13 = math.exp %12 : vector<8x128xf32>
    %14 = math.log1p %13 : vector<8x128xf32>
    %15 = arith.addf %9, %14 : vector<8x128xf32>
    %16 = arith.mulf %5, %15 : vector<8x128xf32>
    %c0_7 = arith.constant 0 : index
    %c0_8 = arith.constant 0 : index
    %17 = vector.load %arg6[%c0_7, %c0_8] : memref<8x1xf32, #tpu.memory_space<vmem>>, vector<8x1xf32>
    %cst_9 = arith.constant dense<0.000000e+00> : vector<8xf32>
    %18 = vector.multi_reduction <add>, %16, %cst_9 [1] : vector<8x128xf32> to vector<8xf32>
    %19 = vector.shape_cast %18 : vector<8xf32> to vector<8x1xf32>
    %20 = arith.addf %17, %19 : vector<8x1xf32>
    %c0_10 = arith.constant 0 : index
    %c0_11 = arith.constant 0 : index
    %21 = vector.load %arg6[%c0_10, %c0_11] : memref<8x1xf32, #tpu.memory_space<vmem>>, vector<8x1xf32>
    tpu.vector_store %arg6[%c0_10, %c0_11], %20 {strides = array<i32>} : memref<8x1xf32, #tpu.memory_space<vmem>>, vector<8x1xf32>,
    %c0_i32_12 = arith.constant 0 : i32
    %22 = arith.cmpi eq, %arg1, %c0_i32_12 : i32
    %23 = arith.extui %22 : i1 to i32
    %c0_i32_13 = arith.constant 0 : i32
    %24 = arith.cmpi ne, %23, %c0_i32_13 : i32
    scf.if %24 {
      %c0_14 = arith.constant 0 : index
      %c0_15 = arith.constant 0 : index
      %25 = vector.load %arg6[%c0_14, %c0_15] : memref<8x1xf32, #tpu.memory_space<vmem>>, vector<8x1xf32>
      %cst_16 = arith.constant 1.250000e-01 : f32
      %26 = vector.broadcast %cst_16 : f32 to vector<8x1xf32>
      %27 = arith.mulf %25, %26 : vector<8x1xf32>
      %c0_17 = arith.constant 0 : index
      %c0_18 = arith.constant 0 : index
      %28 = vector.load %arg5[%c0_17, %c0_18] : memref<8x1xf32, #tpu.memory_space<vmem>>, vector<8x1xf32>
      tpu.vector_store %arg5[%c0_17, %c0_18], %27 {strides = array<i32>} : memref<8x1xf32, #tpu.memory_space<vmem>>, vector<8x1xf32>,
    } else {
    }
    return
  }
  func.func @transform_0(%arg0: i32, %arg1: i32) -> (i32, i32) {
    %c0_i32 = arith.constant 0 : i32
    return %arg0, %arg1 : i32, i32
  }
  func.func @transform_1(%arg0: i32, %arg1: i32) -> (i32, i32) {
    %c0_i32 = arith.constant 0 : i32
    return %arg0, %arg1 : i32, i32
  }
  func.func @transform_2(%arg0: i32, %arg1: i32) -> (i32, i32) {
    %c0_i32 = arith.constant 0 : i32
    return %arg0, %arg1 : i32, i32
  }
  func.func @transform_3(%arg0: i32, %arg1: i32) -> (i32, i32) {
    %c0_i32 = arith.constant 0 : i32
    %c0_i32_0 = arith.constant 0 : i32
    return %arg0, %c0_i32 : i32, i32
  }
}

</mosaic_0001>

<bundles_post_ra>
// kernel: tpu_custom_call.1
= control target key start
LH: loop header
LB: loop body
LE: loop exit
PB: predicated region body
PF: predicated region fallthrough
CT: control target
= control target key end

     0   :  { %8 = vsyncpa [#allocation4], 0  ;;  %s223_s0 = inlined_call_operand.hbm [shape: f32[8,128], index: 0, kind: input, shape index: {}]   ;;  %s224_s1 = inlined_call_operand.hbm [shape: f32[8,128], index: 1, kind: input, shape index: {}]   ;;  %s225_s2 = inlined_call_operand.hbm [shape: f32[8,128], index: 2, kind: input, shape index: {}]   ;;  %s226_s3 = inlined_call_operand.vmem [shape: f32[8,1], index: 3, kind: output, shape index: {}]  }
   0x1   :  { %9 = vsyncpa [#allocation6], 0  ;;  %s26_s14 = sshll.u32 %s224_s1, 4  ;;  %s184_s15 = smov [#allocation5]   ;;  %s27_s14 = int_to_ptr.hbm [resolvable:$true] %s26_s14 }
   0x2   :  { %s28_s16 = sshll.u32 %s184_s15, 4  ;;  %s15_s19 = sshll.u32 %s223_s0, 4  ;;  %s29_s16 = int_to_ptr.vmem [resolvable:$true] %s28_s16  ;;  %s16_s19 = int_to_ptr.hbm [resolvable:$true] %s15_s19 }
   0x3   :  { %31 = dma.hbm_to_vmem [thread:$0]  %s27_s14, 128, %s29_s16, [#allocation6]  }
   0x4   :  { %s185_s20 = smov [#allocation3]   ;;  %s37_s24 = sshll.u32 %s225_s2, 4  ;;  %s38_s24 = int_to_ptr.hbm [resolvable:$true] %s37_s24 }
   0x5   :  { %s17_s21 = sshll.u32 %s185_s20, 4  ;;  %s186_s1 = smov [#allocation7]   ;;  %s18_s21 = int_to_ptr.vmem [resolvable:$true] %s17_s21 }
   0x6   :  { %20 = dma.hbm_to_vmem [thread:$0]  %s16_s19, 128, %s18_s21, [#allocation4]  }
   0x7   :  { %s39_s25 = sshll.u32 %s186_s1, 4  ;;  %s40_s25 = int_to_ptr.vmem [resolvable:$true] %s39_s25 }
   0x8   :  { %42 = dma.hbm_to_vmem [thread:$0]  %s38_s24, 128, %s40_s25, [#allocation6]  }
   0x9   :  { %180 = dma.done.wait [#allocation4], 128  }
   0xa   :  { %181 = vsyncadd [#allocation4], 4294967168 }
   0xb   :  { %182 = dma.done.wait [#allocation6], 256  }
   0xc   :  { %183 = vsyncadd [#allocation6], 4294967040  ;;  %vm59_vm0 = vcmask 7168   ;;  %v187_v0 = vmov 0.0   ;;  %v61_v1 = vld [vmem:[#allocation3] sm:$0xff]  ;;  %v62_v8 = vld [vmem:[#allocation5] sm:$0xff] }
   0xd   :  { %60 = vst.msk [vmem:[#allocation2] sm:$0xff] %vm59_vm0, %v187_v0  ;;  %v67_v2 = vand.u32 2147483647, %v61_v1  ;;  %v64_v10 = vmax.f32 %v61_v1, 0.0  ;;  %v65_v11 = vmul.f32 %v62_v8, %v61_v1  ;;  %v63_v17 = vld [vmem:[#allocation7] sm:$0xff] }
   0xf   :  { %v68_v3 = vsub.f32 0.0, %v67_v2  ;;  %v66_v15 = vsub.f32 %v64_v10, %v65_v11 }
  0x11   :  { %v69_v4 = vmul.f32 1.442695, %v68_v3 }
  0x13   :  { %104 = vpow2.f32 %v69_v4 }
  0x14   :  { %v82_v21 = vld [vmem:[#allocation2] sm:$0xff] }
  0x19   :  { %v105_v5 = vpop.eup %104 }
  0x1a   :  { %v71_v6 = vadd.f32 1.0, %v105_v5  ;;  %v74_v7 = vmul.f32 -0.5, %v105_v5  ;;  %v77_v12 = vand.u32 2147483647, %v105_v5 }
  0x1c   :  { %106 = vlog2.f32 %v71_v6  ;;  %v75_v9 = vadd.f32 1.0, %v74_v7  ;;  %vm78_vm1 = vcmp.lt.f32.partialorder %v77_v12, 0.0004427343 }
  0x1e   :  { %v76_v13 = vmul.f32 %v105_v5, %v75_v9 }
  0x22   :  { %v107_v14 = vpop.eup %106 }
  0x23   :  { %v73_v16 = vmul.f32 0.6931472, %v107_v14 }
  0x25   :  { %v79_v18 = vsel %vm78_vm1, %v76_v13, %v73_v16 }
  0x26   :  { %v80_v19 = vadd.f32 %v79_v18, %v66_v15 }
  0x28   :  { %v81_v20 = vmul.f32 %v80_v19, %v63_v17 }
  0x2a   :  { %83 = vadd.xlane.f32.xlu0 %v81_v20 }
  0x9d   :  { %v84_v22 = vpop.xlane.xlu0 %83 }
  0x9e   :  { %v85_v23 = vadd.f32 %v84_v22, %v82_v21 }
  0xa0   :  { %87 = vst.msk [vmem:[#allocation2] sm:$0xff] %vm59_vm0, %v85_v23 }
  0xa7   :  { %v91_v24 = vld [vmem:[#allocation2] sm:$0xff] }
  0xa8   :  { %v92_v25 = vmul.f32 0.125, %v91_v24 }
  0xaa   :  { %93 = vst.msk [vmem:[%s226_s3] sm:$0xff] %vm59_vm0, %v92_v25 }
  0xab   :  { %98 = vsyncpa [#allocation4], 1 }
  0xac   :  { %99 = vsyncpa [#allocation6], 1 }

</bundles_post_ra>
